<compile_context>
chip_gen: v6e
topology: v6e:2x2x1
jax: 0.10.0
libtpu: 0.0.40
codegen_flags: <defaults>
</compile_context>

<pallas_src>
import functools

import jax
import jax.numpy as jnp
from jax.experimental import pallas as pl
from jax.experimental.pallas import tpu as pltpu

LANE = 128  # lane width (last dim)


def _round_up(x, m):
    return ((x + m - 1) // m) * m


def _sublane(dtype):
    """Minimum sublane multiple for a dtype: 8 (f32), 16 (bf16), 32 (int8/fp8)."""
    return max(8, 32 // jnp.dtype(dtype).itemsize)


def _chip_info():
    """(n_tensorcores, vmem_budget, vmem_cap, tm_default) — conservative defaults."""
    try:
        kind = jax.devices()[0].device_kind.lower()
    except Exception:
        kind = ""
    mib = 1024 * 1024
    if "7x" in kind or "v7" in kind:
        # v7x: 64 MiB VMEM per TC, 2 TCs/chip -> tighter budget, smaller tm.
        return 2, 44 * mib, 60 * mib, 256
    if "v6" in kind:
        return 1, 96 * mib, 112 * mib, 512
    if "v5p" in kind or "v4" in kind:
        return 2, 96 * mib, 112 * mib, 512
    if "v5" in kind:
        # v5e: 128 MiB physical, but only 16 MiB scoped default -> set limit.
        return 1, 96 * mib, 112 * mib, 512
    return 1, 44 * mib, 60 * mib, 256


def _fused_mlp_kernel(x_ref, *refs, n_layers, final_relu):
    """refs = (w0, b0, ..., w_{L-1}, b_{L-1}, o_ref).

    Weights are VMEM-resident; activations stay in vregs/VMEM between layers.
    Accumulation and the bias+ReLU epilogue are f32; the running activation is
    cast back to the compute dtype for the next MXU pass.
    """
    o_ref = refs[-1]
    h = x_ref[...]                                  # (tm, D0p) compute dtype
    for l in range(n_layers):
        w_ref = refs[2 * l]
        b_ref = refs[2 * l + 1]
        y = jnp.dot(h, w_ref[...], preferred_element_type=jnp.float32)
        y = y + b_ref[...].astype(jnp.float32)      # (1, N) bias broadcasts over rows
        last = l == n_layers - 1
        if (not last) or final_relu:
            y = jnp.maximum(y, 0.0)                 # ReLU
            # dropout: identity in eval mode
            # TODO(synk): training-mode dropout via pltpu.prng_seed/prng_random_bits
        if not last:
            h = y.astype(x_ref.dtype)               # back to compute dtype for MXU
        else:
            o_ref[...] = y.astype(o_ref.dtype)


def _weight_bytes(padded_params):
    return sum(int(w.size) * w.dtype.itemsize + int(b.size) * b.dtype.itemsize
               for w, b in padded_params)


def _vmem_need(tm, d0p, dlp, padded_params, x_isz, o_isz, weight_buffers):
    """Rough working-set estimate for the fused kernel (bytes)."""
    max_np = max(w.shape[1] for w, _ in padded_params)
    need = (weight_buffers * _weight_bytes(padded_params)
            + 2 * tm * d0p * x_isz          # x tile, double-buffered
            + 2 * tm * dlp * o_isz          # out tile, double-buffered
            + 2 * tm * max_np * 4)          # live f32 intermediates
    return int(need * 1.15) + 4 * 1024 * 1024


def fused_mlp(x2d, padded_params, *, out_dtype, final_relu=False, true_dims=None):
    """x2d: (M, D0p) lane-padded activations; padded_params: [((Kp,Np) w, (Np,) b)]."""
    M, D0p = x2d.shape
    n_layers = len(padded_params)
    DLp = padded_params[-1][0].shape[1]
    sub = max(_sublane(x2d.dtype), _sublane(out_dtype))
    n_cores, vmem_budget, vmem_cap, tm_default = _chip_info()
    x_isz = x2d.dtype.itemsize
    o_isz = jnp.dtype(out_dtype).itemsize

    # ---- M-tile selection (chip + dtype aware) -----------------------------
    M_pad0 = max(_round_up(M, sub), sub)
    tm_eff = min(tm_default, M_pad0)
    # shrink tm if the fused working set overshoots the per-core VMEM budget
    while tm_eff > sub and _vmem_need(tm_eff, D0p, DLp, padded_params,
                                      x_isz, o_isz, 1) > vmem_budget:
        tm_eff = max(_round_up(tm_eff // 2, sub), sub)
    # split the grid only on 2-TC chips (v7x), never below 256-row MXU tiles
    if n_cores >= 2 and M_pad0 // tm_eff < 2 and tm_eff >= 2 * 256:
        tm_eff = max(_round_up(pl.cdiv(M_pad0, 2), sub), 256)
    M_pad = _round_up(M, tm_eff)
    if M_pad != M:
        x2d = jnp.pad(x2d, ((0, M_pad - M), (0, 0)))

    # ---- cost estimate on TRUE (unpadded) dims -----------------------------
    if true_dims is None:
        true_dims = [(w.shape[0], w.shape[1]) for w, _ in padded_params]
    flops = sum(2 * M * k * n for k, n in true_dims)
    bytes_accessed = M * true_dims[0][0] * x_isz + M * true_dims[-1][1] * o_isz
    bytes_accessed += sum((k * n + n) * padded_params[i][0].dtype.itemsize
                          for i, (k, n) in enumerate(true_dims))

    flat_args = [x2d]
    for (w, b) in padded_params:
        flat_args += [w, b.reshape(1, w.shape[1])]

    def build(weight_pipeline_mode, weight_buffers):
        in_specs = [pl.BlockSpec((tm_eff, D0p), lambda i: (i, 0))]   # row-tiled x
        for (w, b) in padded_params:
            Kp, Np = w.shape
            kw = {} if weight_pipeline_mode is None else {"pipeline_mode": weight_pipeline_mode}
            in_specs += [
                pl.BlockSpec((Kp, Np), lambda i: (0, 0), **kw),      # resident weight
                pl.BlockSpec((1, Np), lambda i: (0, 0), **kw),       # resident bias
            ]
        need = _vmem_need(tm_eff, D0p, DLp, padded_params, x_isz, o_isz, weight_buffers)
        vmem_limit = int(min(max(need, 32 * 1024 * 1024), vmem_cap))
        return pl.pallas_call(
            functools.partial(_fused_mlp_kernel, n_layers=n_layers, final_relu=final_relu),
            out_shape=jax.ShapeDtypeStruct((M_pad, DLp), out_dtype),
            grid=(M_pad // tm_eff,),
            in_specs=in_specs,
            out_specs=pl.BlockSpec((tm_eff, DLp), lambda i: (i, 0)),  # lane-dense output
            compiler_params=pltpu.CompilerParams(
                dimension_semantics=("parallel",),
                vmem_limit_bytes=vmem_limit),
            cost_estimate=pl.CostEstimate(
                flops=flops, transcendentals=0, bytes_accessed=bytes_accessed),
        )

    try:
        # Constant index_map -> no re-DMA per step; single-buffer the weights
        # so the weight stack occupies VMEM once (not twice).
        out = build(pl.Buffered(1), 1)(*flat_args)
    except Exception:
        # Fallback for jax versions without per-spec pipeline_mode support.
        out = build(None, 2)(*flat_args)
    return out[:M]


def init_mlp_params(key, dims, dtype=jnp.float32):
    """Deterministic init mirroring nn.Linear shapes: weight (out,in) -> stored (in,out)."""
    params = []
    for i in range(len(dims) - 1):
        fan_in, fan_out = dims[i], dims[i + 1]
        key, kw, kb = jax.random.split(key, 3)
        bound = 1.0 / jnp.sqrt(fan_in)
        w = jax.random.uniform(kw, (fan_in, fan_out), dtype, -bound, bound)
        b = jax.random.uniform(kb, (fan_out,), dtype, -bound, bound)
        params.append((w, b))
    return params


def pad_params(params, compute_dtype=None):
    """Zero-pad every feature dim to a multiple of 128 lanes (once, off the hot path)."""
    padded = []
    for w, b in params:
        K, N = w.shape
        Kp, Np = _round_up(K, LANE), _round_up(N, LANE)
        wp = jnp.zeros((Kp, Np), w.dtype).at[:K, :N].set(w)
        bp = jnp.zeros((Np,), b.dtype).at[:N].set(b)
        if compute_dtype is not None:
            wp = wp.astype(compute_dtype)
            bp = bp.astype(compute_dtype)
        padded.append((wp, bp))
    return padded


def mlp_forward(x, params, *, compute_dtype=None, _weight_budget_override=None):
    """x: (..., dims[0]) -> (..., dims[-1]). Matches MLP.forward (relu, eval-mode dropout)."""
    *lead, D = x.shape
    out_dim = params[-1][0].shape[1]
    out_dtype = x.dtype
    padded = pad_params(params, compute_dtype)

    h = x.reshape(-1, D)
    if compute_dtype is not None:
        h = h.astype(compute_dtype)              # bf16 inputs -> MXU headline rate
    D0p = padded[0][0].shape[0]
    if D0p != D:
        h = jnp.pad(h, ((0, 0), (0, D0p - D)))

    # Group consecutive layers so each group's single-buffered weight stack fits
    # comfortably in per-core VMEM; groups chain activations through HBM and the
    # group-boundary ReLU is applied inside that group's kernel.
    _, vmem_budget, _, _ = _chip_info()
    weight_budget = _weight_budget_override or int(vmem_budget * 0.6)
    groups, cur, cur_bytes = [], [], 0
    for (w, b), (wp, bp) in zip(params, padded):
        nbytes = int(wp.size) * wp.dtype.itemsize + int(bp.size) * bp.dtype.itemsize
        if cur and cur_bytes + nbytes > weight_budget:
            groups.append(cur)
            cur, cur_bytes = [], 0
        cur.append((wp, bp, w.shape[0], w.shape[1]))
        cur_bytes += nbytes
    groups.append(cur)

    for gi, g in enumerate(groups):
        last_group = gi == len(groups) - 1
        h = fused_mlp(
            h,
            [(wp, bp) for wp, bp, _, _ in g],
            out_dtype=out_dtype if last_group else h.dtype,
            final_relu=not last_group,
            true_dims=[(k, n) for _, _, k, n in g],
        )
    out = h[:, :out_dim]                          # strip lane padding
    return out.reshape(*lead, out_dim)


def mlp_reference(x, params):
    h = x
    for idx, (w, b) in enumerate(params):
        h = h @ w + b
        if idx != len(params) - 1:
            h = jnp.maximum(h, 0.0)
    return h


if __name__ == "__main__":
    key = jax.random.PRNGKey(0)
    dims = [32, 64, 32, 16]          # MLP(dims=[32, 64, 32, 16], activation='relu', dropout=0.1)
    B, S = 2, 8                      # M = B*S = 16 rows

    kx, kp = jax.random.split(key)
    x = jax.random.normal(kx, (B, S, dims[0]), jnp.float32)
    params = init_mlp_params(kp, dims)
    ref = mlp_reference(x, params)

    # 1) f32 compute path (single fused kernel): tight tolerance vs f32 reference.
    out_f32 = jax.block_until_ready(mlp_forward(x, params))
    assert out_f32.shape == (B, S, dims[-1])
    assert jnp.allclose(out_f32, ref, atol=1e-5, rtol=1e-5)

    # 2) bf16 compute path (MXU headline rate on v6e/v7x, f32 accumulation).
    out_bf16 = jax.block_until_ready(mlp_forward(x, params, compute_dtype=jnp.bfloat16))
    assert out_bf16.shape == (B, S, dims[-1])
    assert jnp.allclose(out_bf16, ref, atol=5e-2, rtol=5e-2)

    # 3) Exercise the layer-grouping fallback (weight stack "too big" for one call):
    #    chained fused_mlp calls, with the group-boundary ReLU inside each kernel.
    out_split = jax.block_until_ready(
        mlp_forward(x, params, _weight_budget_override=100_000))
    assert jnp.allclose(out_split, ref, atol=1e-5, rtol=1e-5)

    print("KERNEL_OK")
</pallas_src>

<mosaic_0001>
module attributes {stable_mosaic.version = 11 : i64} {
  func.func @_fused_mlp_kernel(%arg0: i32, %arg1: memref<16x128xf32, #tpu.memory_space<vmem>>, %arg2: memref<128x128xf32, #tpu.memory_space<vmem>>, %arg3: memref<1x128xf32, #tpu.memory_space<vmem>>, %arg4: memref<128x128xf32, #tpu.memory_space<vmem>>, %arg5: memref<1x128xf32, #tpu.memory_space<vmem>>, %arg6: memref<128x128xf32, #tpu.memory_space<vmem>>, %arg7: memref<1x128xf32, #tpu.memory_space<vmem>>, %arg8: memref<16x128xf32, #tpu.memory_space<vmem>>) attributes {dimension_semantics = [#tpu.dimension_semantics<parallel>], iteration_bounds = array<i64: 1>, scalar_prefetch = 0 : i64, scratch_operands = 0 : i64, tpu.core_type = #tpu.core_type<tc>, window_params = [{transform_indices = @transform_0, window_bounds = array<i64: 16, 128>}, {pipeline_mode = #tpu.pipeline_mode<synchronous>, transform_indices = @transform_1, window_bounds = array<i64: 128, 128>}, {pipeline_mode = #tpu.pipeline_mode<synchronous>, transform_indices = @transform_2, window_bounds = array<i64: 1, 128>}, {pipeline_mode = #tpu.pipeline_mode<synchronous>, transform_indices = @transform_3, window_bounds = array<i64: 128, 128>}, {pipeline_mode = #tpu.pipeline_mode<synchronous>, transform_indices = @transform_4, window_bounds = array<i64: 1, 128>}, {pipeline_mode = #tpu.pipeline_mode<synchronous>, transform_indices = @transform_5, window_bounds = array<i64: 128, 128>}, {pipeline_mode = #tpu.pipeline_mode<synchronous>, transform_indices = @transform_6, window_bounds = array<i64: 1, 128>}, {transform_indices = @transform_7, window_bounds = array<i64: 16, 128>}]} {
    %c0 = arith.constant 0 : index
    %c0_0 = arith.constant 0 : index
    %0 = vector.load %arg1[%c0, %c0_0] : memref<16x128xf32, #tpu.memory_space<vmem>>, vector<16x128xf32>
    %c0_1 = arith.constant 0 : index
    %c0_2 = arith.constant 0 : index
    %1 = vector.load %arg2[%c0_1, %c0_2] : memref<128x128xf32, #tpu.memory_space<vmem>>, vector<128x128xf32>
    %cst = arith.constant dense<0.000000e+00> : vector<16x128xf32>
    %2 = tpu.matmul %0, %1, %cst {dimension_numbers = #tpu.dot_dimension_numbers<[1], [0], [0], [1], [0, 0, 1, 1], [], []>} : vector<16x128xf32>, vector<128x128xf32>, vector<16x128xf32> -> vector<16x128xf32>
    %c0_3 = arith.constant 0 : index
    %c0_4 = arith.constant 0 : index
    %3 = vector.load %arg3[%c0_3, %c0_4] : memref<1x128xf32, #tpu.memory_space<vmem>>, vector<1x128xf32>
    %4 = vector.broadcast %3 : vector<1x128xf32> to vector<16x128xf32>
    %5 = arith.addf %2, %4 : vector<16x128xf32>
    %cst_5 = arith.constant 0.000000e+00 : f32
    %6 = vector.broadcast %cst_5 : f32 to vector<16x128xf32>
    %7 = arith.maximumf %5, %6 : vector<16x128xf32>
    %c0_6 = arith.constant 0 : index
    %c0_7 = arith.constant 0 : index
    %8 = vector.load %arg4[%c0_6, %c0_7] : memref<128x128xf32, #tpu.memory_space<vmem>>, vector<128x128xf32>
    %cst_8 = arith.constant dense<0.000000e+00> : vector<16x128xf32>
    %9 = tpu.matmul %7, %8, %cst_8 {dimension_numbers = #tpu.dot_dimension_numbers<[1], [0], [0], [1], [0, 0, 1, 1], [], []>} : vector<16x128xf32>, vector<128x128xf32>, vector<16x128xf32> -> vector<16x128xf32>
    %c0_9 = arith.constant 0 : index
    %c0_10 = arith.constant 0 : index
    %10 = vector.load %arg5[%c0_9, %c0_10] : memref<1x128xf32, #tpu.memory_space<vmem>>, vector<1x128xf32>
    %11 = vector.broadcast %10 : vector<1x128xf32> to vector<16x128xf32>
    %12 = arith.addf %9, %11 : vector<16x128xf32>
    %cst_11 = arith.constant 0.000000e+00 : f32
    %13 = vector.broadcast %cst_11 : f32 to vector<16x128xf32>
    %14 = arith.maximumf %12, %13 : vector<16x128xf32>
    %c0_12 = arith.constant 0 : index
    %c0_13 = arith.constant 0 : index
    %15 = vector.load %arg6[%c0_12, %c0_13] : memref<128x128xf32, #tpu.memory_space<vmem>>, vector<128x128xf32>
    %cst_14 = arith.constant dense<0.000000e+00> : vector<16x128xf32>
    %16 = tpu.matmul %14, %15, %cst_14 {dimension_numbers = #tpu.dot_dimension_numbers<[1], [0], [0], [1], [0, 0, 1, 1], [], []>} : vector<16x128xf32>, vector<128x128xf32>, vector<16x128xf32> -> vector<16x128xf32>
    %c0_15 = arith.constant 0 : index
    %c0_16 = arith.constant 0 : index
    %17 = vector.load %arg7[%c0_15, %c0_16] : memref<1x128xf32, #tpu.memory_space<vmem>>, vector<1x128xf32>
    %18 = vector.broadcast %17 : vector<1x128xf32> to vector<16x128xf32>
    %19 = arith.addf %16, %18 : vector<16x128xf32>
    %c0_17 = arith.constant 0 : index
    %c0_18 = arith.constant 0 : index
    %20 = vector.load %arg8[%c0_17, %c0_18] : memref<16x128xf32, #tpu.memory_space<vmem>>, vector<16x128xf32>
    tpu.vector_store %arg8[%c0_17, %c0_18], %19 {strides = array<i32>} : memref<16x128xf32, #tpu.memory_space<vmem>>, vector<16x128xf32>,
    return
  }
  func.func @transform_0(%arg0: i32) -> (i32, i32) {
    %c0_i32 = arith.constant 0 : i32
    %c0_i32_0 = arith.constant 0 : i32
    return %arg0, %c0_i32 : i32, i32
  }
  func.func @transform_1(%arg0: i32) -> (i32, i32) {
    %c0_i32 = arith.constant 0 : i32
    %c0_i32_0 = arith.constant 0 : i32
    %c0_i32_1 = arith.constant 0 : i32
    return %c0_i32, %c0_i32_0 : i32, i32
  }
  func.func @transform_2(%arg0: i32) -> (i32, i32) {
    %c0_i32 = arith.constant 0 : i32
    %c0_i32_0 = arith.constant 0 : i32
    %c0_i32_1 = arith.constant 0 : i32
    return %c0_i32, %c0_i32_0 : i32, i32
  }
  func.func @transform_3(%arg0: i32) -> (i32, i32) {
    %c0_i32 = arith.constant 0 : i32
    %c0_i32_0 = arith.constant 0 : i32
    %c0_i32_1 = arith.constant 0 : i32
    return %c0_i32, %c0_i32_0 : i32, i32
  }
  func.func @transform_4(%arg0: i32) -> (i32, i32) {
    %c0_i32 = arith.constant 0 : i32
    %c0_i32_0 = arith.constant 0 : i32
    %c0_i32_1 = arith.constant 0 : i32
    return %c0_i32, %c0_i32_0 : i32, i32
  }
  func.func @transform_5(%arg0: i32) -> (i32, i32) {
    %c0_i32 = arith.constant 0 : i32
    %c0_i32_0 = arith.constant 0 : i32
    %c0_i32_1 = arith.constant 0 : i32
    return %c0_i32, %c0_i32_0 : i32, i32
  }
  func.func @transform_6(%arg0: i32) -> (i32, i32) {
    %c0_i32 = arith.constant 0 : i32
    %c0_i32_0 = arith.constant 0 : i32
    %c0_i32_1 = arith.constant 0 : i32
    return %c0_i32, %c0_i32_0 : i32, i32
  }
  func.func @transform_7(%arg0: i32) -> (i32, i32) {
    %c0_i32 = arith.constant 0 : i32
    %c0_i32_0 = arith.constant 0 : i32
    return %arg0, %c0_i32 : i32, i32
  }
}

module attributes {stable_mosaic.version = 11 : i64} {
  func.func @_fused_mlp_kernel(%arg0: i32, %arg1: memref<16x128xf32, #tpu.memory_space<vmem>>, %arg2: memref<128x128xf32, #tpu.memory_space<vmem>>, %arg3: memref<1x128xf32, #tpu.memory_space<vmem>>, %arg4: memref<128x128xf32, #tpu.memory_space<vmem>>, %arg5: memref<1x128xf32, #tpu.memory_space<vmem>>, %arg6: memref<128x128xf32, #tpu.memory_space<vmem>>, %arg7: memref<1x128xf32, #tpu.memory_space<vmem>>, %arg8: memref<16x128xf32, #tpu.memory_space<vmem>>) attributes {dimension_semantics = [#tpu.dimension_semantics<parallel>], iteration_bounds = array<i64: 1>, scalar_prefetch = 0 : i64, scratch_operands = 0 : i64, tpu.core_type = #tpu.core_type<tc>, window_params = [{transform_indices = @transform_0, window_bounds = array<i64: 16, 128>}, {pipeline_mode = #tpu.pipeline_mode<synchronous>, transform_indices = @transform_1, window_bounds = array<i64: 128, 128>}, {pipeline_mode = #tpu.pipeline_mode<synchronous>, transform_indices = @transform_2, window_bounds = array<i64: 1, 128>}, {pipeline_mode = #tpu.pipeline_mode<synchronous>, transform_indices = @transform_3, window_bounds = array<i64: 128, 128>}, {pipeline_mode = #tpu.pipeline_mode<synchronous>, transform_indices = @transform_4, window_bounds = array<i64: 1, 128>}, {pipeline_mode = #tpu.pipeline_mode<synchronous>, transform_indices = @transform_5, window_bounds = array<i64: 128, 128>}, {pipeline_mode = #tpu.pipeline_mode<synchronous>, transform_indices = @transform_6, window_bounds = array<i64: 1, 128>}, {transform_indices = @transform_7, window_bounds = array<i64: 16, 128>}]} {
    %c0 = arith.constant 0 : index
    %c0_0 = arith.constant 0 : index
    %0 = vector.load %arg1[%c0, %c0_0] : memref<16x128xf32, #tpu.memory_space<vmem>>, vector<16x128xf32>
    %c0_1 = arith.constant 0 : index
    %c0_2 = arith.constant 0 : index
    %1 = vector.load %arg2[%c0_1, %c0_2] : memref<128x128xf32, #tpu.memory_space<vmem>>, vector<128x128xf32>
    %cst = arith.constant dense<0.000000e+00> : vector<16x128xf32>
    %2 = tpu.matmul %0, %1, %cst {dimension_numbers = #tpu.dot_dimension_numbers<[1], [0], [0], [1], [0, 0, 1, 1], [], []>} : vector<16x128xf32>, vector<128x128xf32>, vector<16x128xf32> -> vector<16x128xf32>
    %c0_3 = arith.constant 0 : index
    %c0_4 = arith.constant 0 : index
    %3 = vector.load %arg3[%c0_3, %c0_4] : memref<1x128xf32, #tpu.memory_space<vmem>>, vector<1x128xf32>
    %4 = vector.broadcast %3 : vector<1x128xf32> to vector<16x128xf32>
    %5 = arith.addf %2, %4 : vector<16x128xf32>
    %cst_5 = arith.constant 0.000000e+00 : f32
    %6 = vector.broadcast %cst_5 : f32 to vector<16x128xf32>
    %7 = arith.maximumf %5, %6 : vector<16x128xf32>
    %c0_6 = arith.constant 0 : index
    %c0_7 = arith.constant 0 : index
    %8 = vector.load %arg4[%c0_6, %c0_7] : memref<128x128xf32, #tpu.memory_space<vmem>>, vector<128x128xf32>
    %cst_8 = arith.constant dense<0.000000e+00> : vector<16x128xf32>
    %9 = tpu.matmul %7, %8, %cst_8 {dimension_numbers = #tpu.dot_dimension_numbers<[1], [0], [0], [1], [0, 0, 1, 1], [], []>} : vector<16x128xf32>, vector<128x128xf32>, vector<16x128xf32> -> vector<16x128xf32>
    %c0_9 = arith.constant 0 : index
    %c0_10 = arith.constant 0 : index
    %10 = vector.load %arg5[%c0_9, %c0_10] : memref<1x128xf32, #tpu.memory_space<vmem>>, vector<1x128xf32>
    %11 = vector.broadcast %10 : vector<1x128xf32> to vector<16x128xf32>
    %12 = arith.addf %9, %11 : vector<16x128xf32>
    %cst_11 = arith.constant 0.000000e+00 : f32
    %13 = vector.broadcast %cst_11 : f32 to vector<16x128xf32>
    %14 = arith.maximumf %12, %13 : vector<16x128xf32>
    %c0_12 = arith.constant 0 : index
    %c0_13 = arith.constant 0 : index
    %15 = vector.load %arg6[%c0_12, %c0_13] : memref<128x128xf32, #tpu.memory_space<vmem>>, vector<128x128xf32>
    %cst_14 = arith.constant dense<0.000000e+00> : vector<16x128xf32>
    %16 = tpu.matmul %14, %15, %cst_14 {dimension_numbers = #tpu.dot_dimension_numbers<[1], [0], [0], [1], [0, 0, 1, 1], [], []>} : vector<16x128xf32>, vector<128x128xf32>, vector<16x128xf32> -> vector<16x128xf32>
    %c0_15 = arith.constant 0 : index
    %c0_16 = arith.constant 0 : index
    %17 = vector.load %arg7[%c0_15, %c0_16] : memref<1x128xf32, #tpu.memory_space<vmem>>, vector<1x128xf32>
    %18 = vector.broadcast %17 : vector<1x128xf32> to vector<16x128xf32>
    %19 = arith.addf %16, %18 : vector<16x128xf32>
    %c0_17 = arith.constant 0 : index
    %c0_18 = arith.constant 0 : index
    %20 = vector.load %arg8[%c0_17, %c0_18] : memref<16x128xf32, #tpu.memory_space<vmem>>, vector<16x128xf32>
    tpu.vector_store %arg8[%c0_17, %c0_18], %19 {strides = array<i32>} : memref<16x128xf32, #tpu.memory_space<vmem>>, vector<16x128xf32>,
    return
  }
  func.func @transform_0(%arg0: i32) -> (i32, i32) {
    %c0_i32 = arith.constant 0 : i32
    %c0_i32_0 = arith.constant 0 : i32
    return %arg0, %c0_i32 : i32, i32
  }
  func.func @transform_1(%arg0: i32) -> (i32, i32) {
    %c0_i32 = arith.constant 0 : i32
    %c0_i32_0 = arith.constant 0 : i32
    %c0_i32_1 = arith.constant 0 : i32
    return %c0_i32, %c0_i32_0 : i32, i32
  }
  func.func @transform_2(%arg0: i32) -> (i32, i32) {
    %c0_i32 = arith.constant 0 : i32
    %c0_i32_0 = arith.constant 0 : i32
    %c0_i32_1 = arith.constant 0 : i32
    return %c0_i32, %c0_i32_0 : i32, i32
  }
  func.func @transform_3(%arg0: i32) -> (i32, i32) {
    %c0_i32 = arith.constant 0 : i32
    %c0_i32_0 = arith.constant 0 : i32
    %c0_i32_1 = arith.constant 0 : i32
    return %c0_i32, %c0_i32_0 : i32, i32
  }
  func.func @transform_4(%arg0: i32) -> (i32, i32) {
    %c0_i32 = arith.constant 0 : i32
    %c0_i32_0 = arith.constant 0 : i32
    %c0_i32_1 = arith.constant 0 : i32
    return %c0_i32, %c0_i32_0 : i32, i32
  }
  func.func @transform_5(%arg0: i32) -> (i32, i32) {
    %c0_i32 = arith.constant 0 : i32
    %c0_i32_0 = arith.constant 0 : i32
    %c0_i32_1 = arith.constant 0 : i32
    return %c0_i32, %c0_i32_0 : i32, i32
  }
  func.func @transform_6(%arg0: i32) -> (i32, i32) {
    %c0_i32 = arith.constant 0 : i32
    %c0_i32_0 = arith.constant 0 : i32
    %c0_i32_1 = arith.constant 0 : i32
    return %c0_i32, %c0_i32_0 : i32, i32
  }
  func.func @transform_7(%arg0: i32) -> (i32, i32) {
    %c0_i32 = arith.constant 0 : i32
    %c0_i32_0 = arith.constant 0 : i32
    return %arg0, %c0_i32 : i32, i32
  }
}

</mosaic_0001>

<bundles_post_ra>
// kernel: tpu_custom_call.1
= control target key start
LH: loop header
LB: loop body
LE: loop exit
PB: predicated region body
PF: predicated region fallthrough
CT: control target
= control target key end

     0   :  { %12 = vsyncpa [#allocation3], 0  ;;  %s766_s0 = inlined_call_operand.hbm [shape: f32[16,128], index: 0, kind: input, shape index: {}]   ;;  %s767_s1 = inlined_call_operand.hbm [shape: f32[128,128], index: 1, kind: input, shape index: {}]   ;;  %s768_s2 = inlined_call_operand.vmem [shape: f32[1,128], index: 2, kind: input, shape index: {}]   ;;  %s769_s3 = inlined_call_operand.hbm [shape: f32[128,128], index: 3, kind: input, shape index: {}]   ;;  %s770_s4 = inlined_call_operand.vmem [shape: f32[1,128], index: 4, kind: input, shape index: {}]   ;;  %s771_s5 = inlined_call_operand.hbm [shape: f32[128,128], index: 5, kind: input, shape index: {}]   ;;  %s772_s6 = inlined_call_operand.vmem [shape: f32[1,128], index: 6, kind: input, shape index: {}]   ;;  %s773_s7 = inlined_call_operand.hbm [shape: f32[16,128], index: 7, kind: output, shape index: {}]  }
   0x1   :  { %13 = vsyncpa [#allocation6], 0 }
   0x2   :  { %14 = vsyncpa [#allocation9], 0 }
   0x3   :  { %15 = vsyncpa [#allocation4], 0  ;;  %s680_s24 = smov [#allocation5]   ;;  %s681_s26 = smov [#allocation2]  }
   0x4   :  { %s33_s25 = sshll.u32 %s680_s24, 4  ;;  %s21_s27 = sshll.u32 %s681_s26, 4  ;;  %s34_s25 = int_to_ptr.vmem [resolvable:$true] %s33_s25  ;;  %s22_s27 = int_to_ptr.vmem [resolvable:$true] %s21_s27 }
   0x5   :  { %s580_s28 = scalar_lea.vmem %s34_s25, 2048  ;;  %p585_p1 = scmp.lt.s32.totalorder %s34_s25, %s34_s25 }
   0x6   :  { %p581_p0 = scmp.ne.s32.totalorder %s34_s25, %s580_s28  ;;  %p586_p2 = scmp.lt.s32.totalorder %s580_s28, %s580_s28 }
   0x8   :  { %p587_p3 = por %p586_p2, %p585_p1 }
   0xa   :  { %p588_p4 = pnand %p587_p3, %p581_p0 }
   0xc   :  { %591 = shalt.err (!%p588_p4)
}
   0xd   :  { %s682_s29 = smov 128   ;;  %s683_s30 = smov 8  }
   0xe   :  { %39 = dma.hbm_to_vmem [thread:$0]  %s767_s1, 2048, %s34_s25, [#allocation6], %s682_s29, %s682_s29, %s683_s30  }
   0xf   :  { %s600_s10 = scalar_lea.vmem %s22_s27, 256  ;;  %p605_p6 = scmp.lt.s32.totalorder %s22_s27, %s22_s27 }
  0x10   :  { %p601_p5 = scmp.ne.s32.totalorder %s22_s27, %s600_s10  ;;  %p606_p7 = scmp.lt.s32.totalorder %s600_s10, %s600_s10 }
  0x12   :  { %p607_p8 = por %p606_p7, %p605_p6 }
  0x14   :  { %p608_p9 = pnand %p607_p8, %p601_p5 }
  0x16   :  { %611 = shalt.err (!%p608_p9)
}
  0x17   :  { %27 = dma.hbm_to_vmem [thread:$0]  %s766_s0, 256, %s22_s27, [#allocation3], %s682_s29, %s682_s29, %s683_s30  }
  0x18   :  { %s684_s13 = smov [#allocation7]   ;;  %s685_s15 = smov [#allocation8]  }
  0x19   :  { %s47_s14 = sshll.u32 %s684_s13, 4  ;;  %s61_s16 = sshll.u32 %s685_s15, 4  ;;  %s48_s14 = int_to_ptr.vmem [resolvable:$true] %s47_s14  ;;  %s62_s16 = int_to_ptr.vmem [resolvable:$true] %s61_s16 }
  0x1a   :  { %s620_s1 = scalar_lea.vmem %s48_s14, 2048  ;;  %p625_p11 = scmp.lt.s32.totalorder %s48_s14, %s48_s14 }
  0x1b   :  { %p621_p10 = scmp.ne.s32.totalorder %s48_s14, %s620_s1  ;;  %p626_p12 = scmp.lt.s32.totalorder %s620_s1, %s620_s1 }
  0x1d   :  { %p627_p13 = por %p626_p12, %p625_p11 }
  0x1f   :  { %p628_p0 = pnand %p627_p13, %p621_p10 }
  0x21   :  { %631 = shalt.err (!%p628_p0)
}
  0x22   :  { %53 = dma.hbm_to_vmem [thread:$0]  %s769_s3, 2048, %s48_s14, [#allocation6], %s682_s29, %s682_s29, %s683_s30  }
  0x23   :  { %s640_s0 = scalar_lea.vmem %s62_s16, 2048  ;;  %p645_p2 = scmp.lt.s32.totalorder %s62_s16, %s62_s16 }
  0x24   :  { %p641_p1 = scmp.ne.s32.totalorder %s62_s16, %s640_s0  ;;  %p646_p3 = scmp.lt.s32.totalorder %s640_s0, %s640_s0 }
  0x26   :  { %p647_p4 = por %p646_p3, %p645_p2 }
  0x28   :  { %p648_p5 = pnand %p647_p4, %p641_p1 }
  0x2a   :  { %651 = shalt.err (!%p648_p5)
}
  0x2b   :  { %67 = dma.hbm_to_vmem [thread:$0]  %s771_s5, 2048, %s62_s16, [#allocation9], %s682_s29, %s682_s29, %s683_s30  }
  0x2c   :  { %672 = dma.done.wait [#allocation3], 256  }
  0x2d   :  { %673 = vsyncadd [#allocation3], 4294967040 }
  0x2e   :  { %674 = dma.done.wait [#allocation6], 4096  }
  0x2f   :  { %675 = vsyncadd [#allocation6], 4294963200 }
  0x30   :  { %676 = dma.done.wait [#allocation9], 2048  }
  0x31   :  { %677 = vsyncadd [#allocation9], 4294965248  ;;  %v99_v0 = vld [vmem:[#allocation5 + $0x78] sm:$0xff]  ;;  %v98_v1 = vld [vmem:[#allocation5 + $0x70] sm:$0xff]  ;;  %s686_s24 = smov [#allocation10]  }
  0x32   :  { %460 = vmatprep.subr.mxu0 %v99_v0  ;;  %v97_v2 = vld [vmem:[#allocation5 + $0x68] sm:$0xff]  ;;  %v96_v3 = vld [vmem:[#allocation5 + $0x60] sm:$0xff]  ;;  %v82_v4 = vld [vmem:[#allocation2] sm:$0xff]  ;;  %s389_s25 = sshll.u32 %s686_s24, 4  ;;  %s390_s25 = int_to_ptr.vmem [resolvable:$true] %s389_s25 }
  0x33   :  { %461 = vmatpush3.msra.mxu0 %v99_v0  ;;  %v95_v5 = vld [vmem:[#allocation5 + $0x58] sm:$0xff]  ;;  %492 = vmatprep.mubr.f32.mxu0 %v82_v4  ;;  %v198_v7 = vld [vmem:[#allocation7 + $0x70] sm:$0xff]  ;;  %v197_v9 = vld [vmem:[#allocation7 + $0x68] sm:$0xff]  ;;  %p657_p7 = scmp.lt.s32.totalorder %s390_s25, %s390_s25 }
  0x34   :  { %462 = vmatprep.subr.mxu0 %v98_v1  ;;  %v199_v6 = vld [vmem:[#allocation7 + $0x78] sm:$0xff]  ;;  %v94_v8 = vld [vmem:[#allocation5 + $0x50] sm:$0xff]  ;;  %v93_v10 = vld [vmem:[#allocation5 + $0x48] sm:$0xff] }
  0x35   :  { %463 = vmatpush3.msra.mxu0 %v98_v1  ;;  %495 = vmatprep.subr.mxu1 %v199_v6  ;;  %v196_v11 = vld [vmem:[#allocation7 + $0x60] sm:$0xff]  ;;  %v195_v13 = vld [vmem:[#allocation7 + $0x58] sm:$0xff]  ;;  %v194_v15 = vld [vmem:[#allocation7 + $0x50] sm:$0xff] }
  0x36   :  { %464 = vmatprep.subr.mxu0 %v97_v2  ;;  %496 = vmatpush3.msra.mxu1 %v199_v6  ;;  %v92_v12 = vld [vmem:[#allocation5 + $0x40] sm:$0xff]  ;;  %v91_v14 = vld [vmem:[#allocation5 + $0x38] sm:$0xff]  ;;  %v90_v16 = vld [vmem:[#allocation5 + $0x30] sm:$0xff] }
  0x37   :  { %465 = vmatpush3.msra.mxu0 %v97_v2  ;;  %497 = vmatprep.subr.mxu1 %v198_v7  ;;  %v193_v17 = vld [vmem:[#allocation7 + $0x48] sm:$0xff]  ;;  %v192_v19 = vld [vmem:[#allocation7 + $0x40] sm:$0xff]  ;;  %v191_v21 = vld [vmem:[#allocation7 + $0x38] sm:$0xff] }
  0x38   :  { %466 = vmatprep.subr.mxu0 %v96_v3  ;;  %498 = vmatpush3.msra.mxu1 %v198_v7  ;;  %v89_v18 = vld [vmem:[#allocation5 + $0x28] sm:$0xff]  ;;  %v88_v20 = vld [vmem:[#allocation5 + $0x20] sm:$0xff]  ;;  %v87_v22 = vld [vmem:[#allocation5 + $0x18] sm:$0xff] }
  0x39   :  { %467 = vmatpush3.msra.mxu0 %v96_v3  ;;  %499 = vmatprep.subr.mxu1 %v197_v9  ;;  %v190_v23 = vld [vmem:[#allocation7 + $0x30] sm:$0xff]  ;;  %v189_v25 = vld [vmem:[#allocation7 + $0x28] sm:$0xff]  ;;  %v188_v27 = vld [vmem:[#allocation7 + $0x20] sm:$0xff] }
  0x3a   :  { %468 = vmatprep.subr.mxu0 %v95_v5  ;;  %500 = vmatpush3.msra.mxu1 %v197_v9  ;;  %v86_v24 = vld [vmem:[#allocation5 + $0x10] sm:$0xff]  ;;  %v85_v26 = vld [vmem:[#allocation5 + $0x8] sm:$0xff]  ;;  %v84_v28 = vld [vmem:[#allocation5] sm:$0xff] }
  0x3b   :  { %469 = vmatpush3.msra.mxu0 %v95_v5  ;;  %501 = vmatprep.subr.mxu1 %v196_v11  ;;  %v83_v29 = vld [vmem:[#allocation2 + $0x8] sm:$0xff]  ;;  %v186_v31 = vld [vmem:[#allocation7 + $0x10] sm:$0xff]  ;;  %v185_v32 = vld [vmem:[#allocation7 + $0x8] sm:$0xff] }
  0x3c   :  { %470 = vmatprep.subr.mxu0 %v94_v8  ;;  %502 = vmatpush3.msra.mxu1 %v196_v11  ;;  %v187_v30 = vld [vmem:[#allocation7 + $0x18] sm:$0xff]  ;;  %v184_v33 = vld [vmem:[#allocation7] sm:$0xff]  ;;  %v298_v35 = vld [vmem:[#allocation8 + $0x70] sm:$0xff] }
  0x3d   :  { %471 = vmatpush3.msra.mxu0 %v94_v8  ;;  %503 = vmatprep.subr.mxu1 %v195_v13  ;;  %v299_v34 = vld [vmem:[#allocation8 + $0x78] sm:$0xff]  ;;  %v297_v36 = vld [vmem:[#allocation8 + $0x68] sm:$0xff]  ;;  %v296_v37 = vld [vmem:[#allocation8 + $0x60] sm:$0xff] }
  0x3e   :  { %472 = vmatprep.subr.mxu0 %v93_v10  ;;  %504 = vmatpush3.msra.mxu1 %v195_v13  ;;  %v295_v38 = vld [vmem:[#allocation8 + $0x58] sm:$0xff]  ;;  %v294_v39 = vld [vmem:[#allocation8 + $0x50] sm:$0xff]  ;;  %v293_v40 = vld [vmem:[#allocation8 + $0x48] sm:$0xff] }
  0x3f   :  { %473 = vmatpush3.msra.mxu0 %v93_v10  ;;  %505 = vmatprep.subr.mxu1 %v194_v15  ;;  %v292_v41 = vld [vmem:[#allocation8 + $0x40] sm:$0xff]  ;;  %v291_v42 = vld [vmem:[#allocation8 + $0x38] sm:$0xff]  ;;  %v290_v43 = vld [vmem:[#allocation8 + $0x30] sm:$0xff] }
  0x40   :  { %474 = vmatprep.subr.mxu0 %v92_v12  ;;  %506 = vmatpush3.msra.mxu1 %v194_v15  ;;  %v289_v44 = vld [vmem:[#allocation8 + $0x28] sm:$0xff]  ;;  %v288_v45 = vld [vmem:[#allocation8 + $0x20] sm:$0xff]  ;;  %v403_v46 = vld [vmem:[%s768_s2] ss:$0 sm:$0xff] }
  0x41   :  { %475 = vmatpush3.msra.mxu0 %v92_v12  ;;  %507 = vmatprep.subr.mxu1 %v193_v17  ;;  %v287_v53 = vld [vmem:[#allocation8 + $0x18] sm:$0xff]  ;;  %v286_v54 = vld [vmem:[#allocation8 + $0x10] sm:$0xff]  ;;  %v285_v55 = vld [vmem:[#allocation8 + $0x8] sm:$0xff] }
  0x42   :  { %476 = vmatprep.subr.mxu0 %v91_v14  ;;  %508 = vmatpush3.msra.mxu1 %v193_v17  ;;  %v284_v56 = vld [vmem:[#allocation8] sm:$0xff]  ;;  %v404_v57 = vld [vmem:[%s770_s4] ss:$0 sm:$0xff]  ;;  %s652_s4 = scalar_lea.vmem %s390_s25, 256 }
  0x43   :  { %477 = vmatpush3.msra.mxu0 %v91_v14  ;;  %509 = vmatprep.subr.mxu1 %v192_v19  ;;  %v405_v0 = vld [vmem:[%s772_s6] ss:$0 sm:$0xff]  ;;  %p653_p6 = scmp.ne.s32.totalorder %s390_s25, %s652_s4  ;;  %p658_p8 = scmp.lt.s32.totalorder %s652_s4, %s652_s4 }
  0x44   :  { %478 = vmatprep.subr.mxu0 %v90_v16  ;;  %510 = vmatpush3.msra.mxu1 %v192_v19 }
  0x45   :  { %479 = vmatpush3.msra.mxu0 %v90_v16  ;;  %511 = vmatprep.subr.mxu1 %v191_v21  ;;  %p659_p9 = por %p658_p8, %p657_p7 }
  0x46   :  { %480 = vmatprep.subr.mxu0 %v89_v18  ;;  %512 = vmatpush3.msra.mxu1 %v191_v21 }
  0x47   :  { %481 = vmatpush3.msra.mxu0 %v89_v18  ;;  %513 = vmatprep.subr.mxu1 %v190_v23  ;;  %p660_p10 = pnand %p659_p9, %p653_p6 }
  0x48   :  { %482 = vmatprep.subr.mxu0 %v88_v20  ;;  %514 = vmatpush3.msra.mxu1 %v190_v23 }
  0x49   :  { %483 = vmatpush3.msra.mxu0 %v88_v20  ;;  %515 = vmatprep.subr.mxu1 %v189_v25 }
  0x4a   :  { %484 = vmatprep.subr.mxu0 %v87_v22  ;;  %516 = vmatpush3.msra.mxu1 %v189_v25 }
  0x4b   :  { %485 = vmatpush3.msra.mxu0 %v87_v22  ;;  %517 = vmatprep.subr.mxu1 %v188_v27 }
  0x4c   :  { %486 = vmatprep.subr.mxu0 %v86_v24  ;;  %518 = vmatpush3.msra.mxu1 %v188_v27 }
  0x4d   :  { %487 = vmatpush3.msra.mxu0 %v86_v24  ;;  %519 = vmatprep.subr.mxu1 %v187_v30 }
  0x4e   :  { %488 = vmatprep.subr.mxu0 %v85_v26  ;;  %520 = vmatpush3.msra.mxu1 %v187_v30 }
  0x4f   :  { %489 = vmatpush3.msra.mxu0 %v85_v26  ;;  %521 = vmatprep.subr.mxu1 %v186_v31 }
  0x50   :  { %490 = vmatprep.subr.mxu0 %v84_v28  ;;  %522 = vmatpush3.msra.mxu1 %v186_v31 }
  0x51   :  { %491 = vmatpush3.msra.mxu0 %v84_v28  ;;  %523 = vmatprep.subr.mxu1 %v185_v32 }
  0x52   :  { %493 = vmatmul.mubr.f32.vlgmr.msra.gmra.mxu0 %v83_v29  ;;  %524 = vmatpush3.msra.mxu1 %v185_v32 }
  0x53   :  { %525 = vmatprep.subr.mxu1 %v184_v33  ;;  %530 = vmatprep.subr.mxu0 %v299_v34 }
  0x54   :  { %526 = vmatpush3.msra.mxu1 %v184_v33  ;;  %531 = vmatpush3.msra.mxu0 %v299_v34 }
  0x55   :  { %532 = vmatprep.subr.mxu0 %v298_v35 }
  0x56   :  { %533 = vmatpush3.msra.mxu0 %v298_v35 }
  0x57   :  { %534 = vmatprep.subr.mxu0 %v297_v36 }
  0x58   :  { %535 = vmatpush3.msra.mxu0 %v297_v36 }
  0x59   :  { %536 = vmatprep.subr.mxu0 %v296_v37 }
  0x5a   :  { %537 = vmatpush3.msra.mxu0 %v296_v37 }
  0x5b   :  { %538 = vmatprep.subr.mxu0 %v295_v38 }
  0x5c   :  { %539 = vmatpush3.msra.mxu0 %v295_v38 }
  0x5d   :  { %540 = vmatprep.subr.mxu0 %v294_v39 }
  0x5e   :  { %541 = vmatpush3.msra.mxu0 %v294_v39 }
  0x5f   :  { %542 = vmatprep.subr.mxu0 %v293_v40 }
  0x60   :  { %543 = vmatpush3.msra.mxu0 %v293_v40 }
  0x61   :  { %544 = vmatprep.subr.mxu0 %v292_v41 }
  0x62   :  { %545 = vmatpush3.msra.mxu0 %v292_v41 }
  0x63   :  { %546 = vmatprep.subr.mxu0 %v291_v42 }
  0x64   :  { %547 = vmatpush3.msra.mxu0 %v291_v42 }
  0x65   :  { %548 = vmatprep.subr.mxu0 %v290_v43 }
  0x66   :  { %549 = vmatpush3.msra.mxu0 %v290_v43 }
  0x67   :  { %550 = vmatprep.subr.mxu0 %v289_v44 }
  0x68   :  { %551 = vmatpush3.msra.mxu0 %v289_v44 }
  0x69   :  { %552 = vmatprep.subr.mxu0 %v288_v45 }
  0x6a   :  { %553 = vmatpush3.msra.mxu0 %v288_v45 }
  0x6b   :  { %554 = vmatprep.subr.mxu0 %v287_v53 }
  0x6c   :  { %555 = vmatpush3.msra.mxu0 %v287_v53 }
  0x6d   :  { %556 = vmatprep.subr.mxu0 %v286_v54 }
  0x6e   :  { %557 = vmatpush3.msra.mxu0 %v286_v54 }
  0x6f   :  { %558 = vmatprep.subr.mxu0 %v285_v55 }
  0x70   :  { %559 = vmatpush3.msra.mxu0 %v285_v55 }
  0x71   :  { %560 = vmatprep.subr.mxu0 %v284_v56 }
  0x72   :  { %561 = vmatpush3.msra.mxu0 %v284_v56 }
 0x112   :  { %v494_v47 = vpop.f32.mrf.mxu0 }
 0x113   :  { %v179_v48 = vadd.f32 %v494_v47, %v403_v46 }
 0x114   :  { %v173_v49 = vpop.f32.mrf.mxu0 }
 0x115   :  { %v174_v50 = vadd.f32 %v403_v46, %v173_v49  ;;  %v183_v52 = vmax.f32 %v179_v48, 0.0 }
 0x117   :  { %v182_v51 = vmax.f32 %v174_v50, 0.0 }
 0x119   :  { %527 = vmatprep.mubr.f32.mxu1 %v182_v51 }
 0x11a   :  { %528 = vmatmul.mubr.f32.vlgmr.msra.gmra.mxu1 %v183_v52 }
 0x1da   :  { %v529_v58 = vpop.f32.mrf.mxu1 }
 0x1db   :  { %v279_v59 = vadd.f32 %v529_v58, %v404_v57 }
 0x1dc   :  { %v273_v60 = vpop.f32.mrf.mxu1 }
 0x1dd   :  { %v274_v61 = vadd.f32 %v404_v57, %v273_v60  ;;  %v283_v63 = vmax.f32 %v279_v59, 0.0 }
 0x1df   :  { %v282_v62 = vmax.f32 %v274_v61, 0.0 }
 0x1e1   :  { %562 = vmatprep.mubr.f32.mxu0 %v282_v62 }
 0x1e2   :  { %563 = vmatmul.mubr.f32.vlgmr.msra.gmra.mxu0 %v283_v63 }
 0x2a2   :  { %v564_v1 = vpop.f32.mrf.mxu0 }
 0x2a3   :  { %v379_v2 = vadd.f32 %v564_v1, %v405_v0 }
 0x2a4   :  { %v373_v3 = vpop.f32.mrf.mxu0 }
 0x2a5   :  { %383 = vst [vmem:[#allocation10 + $0x8] sm:$0xff] %v379_v2  ;;  %v374_v4 = vadd.f32 %v405_v0, %v373_v3 }
 0x2a7   :  { %382 = vst [vmem:[#allocation10] sm:$0xff] %v374_v4 }
 0x2a8   :  { %663 = shalt.err (!%p660_p10)
}
 0x2a9   :  { %395 = dma.vmem_to_hbm [thread:$0]  %s390_s25, 256, %s773_s7, [#allocation4], %s682_s29, %s682_s29, %s683_s30  }
 0x2aa   :  { %678 = dma.done.wait [#allocation4], 256  }
 0x2ab   :  { %679 = vsyncadd [#allocation4], 4294967040 }
 0x2ac   :  { %399 = vsyncpa [#allocation3], 1 }
 0x2ad   :  { %400 = vsyncpa [#allocation6], 1 }
 0x2ae   :  { %401 = vsyncpa [#allocation9], 1 }
 0x2af   :  { %402 = vsyncpa [#allocation4], 1 }

// kernel: tpu_custom_call.1
= control target key start
LH: loop header
LB: loop body
LE: loop exit
PB: predicated region body
PF: predicated region fallthrough
CT: control target
= control target key end

     0   :  { %12 = vsyncpa [#allocation3], 0  ;;  %s766_s0 = inlined_call_operand.hbm [shape: f32[16,128], index: 0, kind: input, shape index: {}]   ;;  %s767_s1 = inlined_call_operand.hbm [shape: f32[128,128], index: 1, kind: input, shape index: {}]   ;;  %s768_s2 = inlined_call_operand.vmem [shape: f32[1,128], index: 2, kind: input, shape index: {}]   ;;  %s769_s3 = inlined_call_operand.hbm [shape: f32[128,128], index: 3, kind: input, shape index: {}]   ;;  %s770_s4 = inlined_call_operand.vmem [shape: f32[1,128], index: 4, kind: input, shape index: {}]   ;;  %s771_s5 = inlined_call_operand.hbm [shape: f32[128,128], index: 5, kind: input, shape index: {}]   ;;  %s772_s6 = inlined_call_operand.vmem [shape: f32[1,128], index: 6, kind: input, shape index: {}]   ;;  %s773_s7 = inlined_call_operand.hbm [shape: f32[16,128], index: 7, kind: output, shape index: {}]  }
   0x1   :  { %13 = vsyncpa [#allocation6], 0 }
   0x2   :  { %14 = vsyncpa [#allocation9], 0 }
   0x3   :  { %15 = vsyncpa [#allocation4], 0  ;;  %s680_s24 = smov [#allocation5]   ;;  %s681_s26 = smov [#allocation2]  }
   0x4   :  { %s33_s25 = sshll.u32 %s680_s24, 4  ;;  %s21_s27 = sshll.u32 %s681_s26, 4  ;;  %s34_s25 = int_to_ptr.vmem [resolvable:$true] %s33_s25  ;;  %s22_s27 = int_to_ptr.vmem [resolvable:$true] %s21_s27 }
   0x5   :  { %s580_s28 = scalar_lea.vmem %s34_s25, 2048  ;;  %p585_p1 = scmp.lt.s32.totalorder %s34_s25, %s34_s25 }
   0x6   :  { %p581_p0 = scmp.ne.s32.totalorder %s34_s25, %s580_s28  ;;  %p586_p2 = scmp.lt.s32.totalorder %s580_s28, %s580_s28 }
   0x8   :  { %p587_p3 = por %p586_p2, %p585_p1 }
   0xa   :  { %p588_p4 = pnand %p587_p3, %p581_p0 }
   0xc   :  { %591 = shalt.err (!%p588_p4)
}
   0xd   :  { %s682_s29 = smov 128   ;;  %s683_s30 = smov 8  }
   0xe   :  { %39 = dma.hbm_to_vmem [thread:$0]  %s767_s1, 2048, %s34_s25, [#allocation6], %s682_s29, %s682_s29, %s683_s30  }
   0xf   :  { %s600_s10 = scalar_lea.vmem %s22_s27, 256  ;;  %p605_p6 = scmp.lt.s32.totalorder %s22_s27, %s22_s27 }
  0x10   :  { %p601_p5 = scmp.ne.s32.totalorder %s22_s27, %s600_s10  ;;  %p606_p7 = scmp.lt.s32.totalorder %s600_s10, %s600_s10 }
  0x12   :  { %p607_p8 = por %p606_p7, %p605_p6 }
  0x14   :  { %p608_p9 = pnand %p607_p8, %p601_p5 }
  0x16   :  { %611 = shalt.err (!%p608_p9)
}
  0x17   :  { %27 = dma.hbm_to_vmem [thread:$0]  %s766_s0, 256, %s22_s27, [#allocation3], %s682_s29, %s682_s29, %s683_s30  }
  0x18   :  { %s684_s13 = smov [#allocation7]   ;;  %s685_s15 = smov [#allocation8]  }
  0x19   :  { %s47_s14 = sshll.u32 %s684_s13, 4  ;;  %s61_s16 = sshll.u32 %s685_s15, 4  ;;  %s48_s14 = int_to_ptr.vmem [resolvable:$true] %s47_s14  ;;  %s62_s16 = int_to_ptr.vmem [resolvable:$true] %s61_s16 }
  0x1a   :  { %s620_s1 = scalar_lea.vmem %s48_s14, 2048  ;;  %p625_p11 = scmp.lt.s32.totalorder %s48_s14, %s48_s14 }
  0x1b   :  { %p621_p10 = scmp.ne.s32.totalorder %s48_s14, %s620_s1  ;;  %p626_p12 = scmp.lt.s32.totalorder %s620_s1, %s620_s1 }
  0x1d   :  { %p627_p13 = por %p626_p12, %p625_p11 }
  0x1f   :  { %p628_p0 = pnand %p627_p13, %p621_p10 }
  0x21   :  { %631 = shalt.err (!%p628_p0)
}
  0x22   :  { %53 = dma.hbm_to_vmem [thread:$0]  %s769_s3, 2048, %s48_s14, [#allocation6], %s682_s29, %s682_s29, %s683_s30  }
  0x23   :  { %s640_s0 = scalar_lea.vmem %s62_s16, 2048  ;;  %p645_p2 = scmp.lt.s32.totalorder %s62_s16, %s62_s16 }
  0x24   :  { %p641_p1 = scmp.ne.s32.totalorder %s62_s16, %s640_s0  ;;  %p646_p3 = scmp.lt.s32.totalorder %s640_s0, %s640_s0 }
  0x26   :  { %p647_p4 = por %p646_p3, %p645_p2 }
  0x28   :  { %p648_p5 = pnand %p647_p4, %p641_p1 }
  0x2a   :  { %651 = shalt.err (!%p648_p5)
}
  0x2b   :  { %67 = dma.hbm_to_vmem [thread:$0]  %s771_s5, 2048, %s62_s16, [#allocation9], %s682_s29, %s682_s29, %s683_s30  }
  0x2c   :  { %672 = dma.done.wait [#allocation3], 256  }
  0x2d   :  { %673 = vsyncadd [#allocation3], 4294967040 }
  0x2e   :  { %674 = dma.done.wait [#allocation6], 4096  }
  0x2f   :  { %675 = vsyncadd [#allocation6], 4294963200 }
  0x30   :  { %676 = dma.done.wait [#allocation9], 2048  }
  0x31   :  { %677 = vsyncadd [#allocation9], 4294965248  ;;  %v99_v0 = vld [vmem:[#allocation5 + $0x78] sm:$0xff]  ;;  %v98_v1 = vld [vmem:[#allocation5 + $0x70] sm:$0xff]  ;;  %s686_s24 = smov [#allocation10]  }
  0x32   :  { %460 = vmatprep.subr.mxu0 %v99_v0  ;;  %v97_v2 = vld [vmem:[#allocation5 + $0x68] sm:$0xff]  ;;  %v96_v3 = vld [vmem:[#allocation5 + $0x60] sm:$0xff]  ;;  %v82_v4 = vld [vmem:[#allocation2] sm:$0xff]  ;;  %s389_s25 = sshll.u32 %s686_s24, 4  ;;  %s390_s25 = int_to_ptr.vmem [resolvable:$true] %s389_s25 }
  0x33   :  { %461 = vmatpush3.msra.mxu0 %v99_v0  ;;  %v95_v5 = vld [vmem:[#allocation5 + $0x58] sm:$0xff]  ;;  %492 = vmatprep.mubr.f32.mxu0 %v82_v4  ;;  %v198_v7 = vld [vmem:[#allocation7 + $0x70] sm:$0xff]  ;;  %v197_v9 = vld [vmem:[#allocation7 + $0x68] sm:$0xff]  ;;  %p657_p7 = scmp.lt.s32.totalorder %s390_s25, %s390_s25 }
  0x34   :  { %462 = vmatprep.subr.mxu0 %v98_v1  ;;  %v199_v6 = vld [vmem:[#allocation7 + $0x78] sm:$0xff]  ;;  %v94_v8 = vld [vmem:[#allocation5 + $0x50] sm:$0xff]  ;;  %v93_v10 = vld [vmem:[#allocation5 + $0x48] sm:$0xff] }
  0x35   :  { %463 = vmatpush3.msra.mxu0 %v98_v1  ;;  %495 = vmatprep.subr.mxu1 %v199_v6  ;;  %v196_v11 = vld [vmem:[#allocation7 + $0x60] sm:$0xff]  ;;  %v195_v13 = vld [vmem:[#allocation7 + $0x58] sm:$0xff]  ;;  %v194_v15 = vld [vmem:[#allocation7 + $0x50] sm:$0xff] }
  0x36   :  { %464 = vmatprep.subr.mxu0 %v97_v2  ;;  %496 = vmatpush3.msra.mxu1 %v199_v6  ;;  %v92_v12 = vld [vmem:[#allocation5 + $0x40] sm:$0xff]  ;;  %v91_v14 = vld [vmem:[#allocation5 + $0x38] sm:$0xff]  ;;  %v90_v16 = vld [vmem:[#allocation5 + $0x30] sm:$0xff] }
  0x37   :  { %465 = vmatpush3.msra.mxu0 %v97_v2  ;;  %497 = vmatprep.subr.mxu1 %v198_v7  ;;  %v193_v17 = vld [vmem:[#allocation7 + $0x48] sm:$0xff]  ;;  %v192_v19 = vld [vmem:[#allocation7 + $0x40] sm:$0xff]  ;;  %v191_v21 = vld [vmem:[#allocation7 + $0x38] sm:$0xff] }
  0x38   :  { %466 = vmatprep.subr.mxu0 %v96_v3  ;;  %498 = vmatpush3.msra.mxu1 %v198_v7  ;;  %v89_v18 = vld [vmem:[#allocation5 + $0x28] sm:$0xff]  ;;  %v88_v20 = vld [vmem:[#allocation5 + $0x20] sm:$0xff]  ;;  %v87_v22 = vld [vmem:[#allocation5 + $0x18] sm:$0xff] }
  0x39   :  { %467 = vmatpush3.msra.mxu0 %v96_v3  ;;  %499 = vmatprep.subr.mxu1 %v197_v9  ;;  %v190_v23 = vld [vmem:[#allocation7 + $0x30] sm:$0xff]  ;;  %v189_v25 = vld [vmem:[#allocation7 + $0x28] sm:$0xff]  ;;  %v188_v27 = vld [vmem:[#allocation7 + $0x20] sm:$0xff] }
  0x3a   :  { %468 = vmatprep.subr.mxu0 %v95_v5  ;;  %500 = vmatpush3.msra.mxu1 %v197_v9  ;;  %v86_v24 = vld [vmem:[#allocation5 + $0x10] sm:$0xff]  ;;  %v85_v26 = vld [vmem:[#allocation5 + $0x8] sm:$0xff]  ;;  %v84_v28 = vld [vmem:[#allocation5] sm:$0xff] }
  0x3b   :  { %469 = vmatpush3.msra.mxu0 %v95_v5  ;;  %501 = vmatprep.subr.mxu1 %v196_v11  ;;  %v83_v29 = vld [vmem:[#allocation2 + $0x8] sm:$0xff]  ;;  %v186_v31 = vld [vmem:[#allocation7 + $0x10] sm:$0xff]  ;;  %v185_v32 = vld [vmem:[#allocation7 + $0x8] sm:$0xff] }
  0x3c   :  { %470 = vmatprep.subr.mxu0 %v94_v8  ;;  %502 = vmatpush3.msra.mxu1 %v196_v11  ;;  %v187_v30 = vld [vmem:[#allocation7 + $0x18] sm:$0xff]  ;;  %v184_v33 = vld [vmem:[#allocation7] sm:$0xff]  ;;  %v298_v35 = vld [vmem:[#allocation8 + $0x70] sm:$0xff] }
  0x3d   :  { %471 = vmatpush3.msra.mxu0 %v94_v8  ;;  %503 = vmatprep.subr.mxu1 %v195_v13  ;;  %v299_v34 = vld [vmem:[#allocation8 + $0x78] sm:$0xff]  ;;  %v297_v36 = vld [vmem:[#allocation8 + $0x68] sm:$0xff]  ;;  %v296_v37 = vld [vmem:[#allocation8 + $0x60] sm:$0xff] }
  0x3e   :  { %472 = vmatprep.subr.mxu0 %v93_v10  ;;  %504 = vmatpush3.msra.mxu1 %v195_v13  ;;  %v295_v38 = vld [vmem:[#allocation8 + $0x58] sm:$0xff]  ;;  %v294_v39 = vld [vmem:[#allocation8 + $0x50] sm:$0xff]  ;;  %v293_v40 = vld [vmem:[#allocation8 + $0x48] sm:$0xff] }
  0x3f   :  { %473 = vmatpush3.msra.mxu0 %v93_v10  ;;  %505 = vmatprep.subr.mxu1 %v194_v15  ;;  %v292_v41 = vld [vmem:[#allocation8 + $0x40] sm:$0xff]  ;;  %v291_v42 = vld [vmem:[#allocation8 + $0x38] sm:$0xff]  ;;  %v290_v43 = vld [vmem:[#allocation8 + $0x30] sm:$0xff] }
  0x40   :  { %474 = vmatprep.subr.mxu0 %v92_v12  ;;  %506 = vmatpush3.msra.mxu1 %v194_v15  ;;  %v289_v44 = vld [vmem:[#allocation8 + $0x28] sm:$0xff]  ;;  %v288_v45 = vld [vmem:[#allocation8 + $0x20] sm:$0xff]  ;;  %v403_v46 = vld [vmem:[%s768_s2] ss:$0 sm:$0xff] }
  0x41   :  { %475 = vmatpush3.msra.mxu0 %v92_v12  ;;  %507 = vmatprep.subr.mxu1 %v193_v17  ;;  %v287_v53 = vld [vmem:[#allocation8 + $0x18] sm:$0xff]  ;;  %v286_v54 = vld [vmem:[#allocation8 + $0x10] sm:$0xff]  ;;  %v285_v55 = vld [vmem:[#allocation8 + $0x8] sm:$0xff] }
  0x42   :  { %476 = vmatprep.subr.mxu0 %v91_v14  ;;  %508 = vmatpush3.msra.mxu1 %v193_v17  ;;  %v284_v56 = vld [vmem:[#allocation8] sm:$0xff]  ;;  %v404_v57 = vld [vmem:[%s770_s4] ss:$0 sm:$0xff]  ;;  %s652_s4 = scalar_lea.vmem %s390_s25, 256 }
  0x43   :  { %477 = vmatpush3.msra.mxu0 %v91_v14  ;;  %509 = vmatprep.subr.mxu1 %v192_v19  ;;  %v405_v0 = vld [vmem:[%s772_s6] ss:$0 sm:$0xff]  ;;  %p653_p6 = scmp.ne.s32.totalorder %s390_s25, %s652_s4  ;;  %p658_p8 = scmp.lt.s32.totalorder %s652_s4, %s652_s4 }
  0x44   :  { %478 = vmatprep.subr.mxu0 %v90_v16  ;;  %510 = vmatpush3.msra.mxu1 %v192_v19 }
  0x45   :  { %479 = vmatpush3.msra.mxu0 %v90_v16  ;;  %511 = vmatprep.subr.mxu1 %v191_v21  ;;  %p659_p9 = por %p658_p8, %p657_p7 }
  0x46   :  { %480 = vmatprep.subr.mxu0 %v89_v18  ;;  %512 = vmatpush3.msra.mxu1 %v191_v21 }
  0x47   :  { %481 = vmatpush3.msra.mxu0 %v89_v18  ;;  %513 = vmatprep.subr.mxu1 %v190_v23  ;;  %p660_p10 = pnand %p659_p9, %p653_p6 }
  0x48   :  { %482 = vmatprep.subr.mxu0 %v88_v20  ;;  %514 = vmatpush3.msra.mxu1 %v190_v23 }
  0x49   :  { %483 = vmatpush3.msra.mxu0 %v88_v20  ;;  %515 = vmatprep.subr.mxu1 %v189_v25 }
  0x4a   :  { %484 = vmatprep.subr.mxu0 %v87_v22  ;;  %516 = vmatpush3.msra.mxu1 %v189_v25 }
  0x4b   :  { %485 = vmatpush3.msra.mxu0 %v87_v22  ;;  %517 = vmatprep.subr.mxu1 %v188_v27 }
  0x4c   :  { %486 = vmatprep.subr.mxu0 %v86_v24  ;;  %518 = vmatpush3.msra.mxu1 %v188_v27 }
  0x4d   :  { %487 = vmatpush3.msra.mxu0 %v86_v24  ;;  %519 = vmatprep.subr.mxu1 %v187_v30 }
  0x4e   :  { %488 = vmatprep.subr.mxu0 %v85_v26  ;;  %520 = vmatpush3.msra.mxu1 %v187_v30 }
  0x4f   :  { %489 = vmatpush3.msra.mxu0 %v85_v26  ;;  %521 = vmatprep.subr.mxu1 %v186_v31 }
  0x50   :  { %490 = vmatprep.subr.mxu0 %v84_v28  ;;  %522 = vmatpush3.msra.mxu1 %v186_v31 }
  0x51   :  { %491 = vmatpush3.msra.mxu0 %v84_v28  ;;  %523 = vmatprep.subr.mxu1 %v185_v32 }
  0x52   :  { %493 = vmatmul.mubr.f32.vlgmr.msra.gmra.mxu0 %v83_v29  ;;  %524 = vmatpush3.msra.mxu1 %v185_v32 }
  0x53   :  { %525 = vmatprep.subr.mxu1 %v184_v33  ;;  %530 = vmatprep.subr.mxu0 %v299_v34 }
  0x54   :  { %526 = vmatpush3.msra.mxu1 %v184_v33  ;;  %531 = vmatpush3.msra.mxu0 %v299_v34 }
  0x55   :  { %532 = vmatprep.subr.mxu0 %v298_v35 }
  0x56   :  { %533 = vmatpush3.msra.mxu0 %v298_v35 }
  0x57   :  { %534 = vmatprep.subr.mxu0 %v297_v36 }
  0x58   :  { %535 = vmatpush3.msra.mxu0 %v297_v36 }
  0x59   :  { %536 = vmatprep.subr.mxu0 %v296_v37 }
  0x5a   :  { %537 = vmatpush3.msra.mxu0 %v296_v37 }
  0x5b   :  { %538 = vmatprep.subr.mxu0 %v295_v38 }
  0x5c   :  { %539 = vmatpush3.msra.mxu0 %v295_v38 }
  0x5d   :  { %540 = vmatprep.subr.mxu0 %v294_v39 }
  0x5e   :  { %541 = vmatpush3.msra.mxu0 %v294_v39 }
  0x5f   :  { %542 = vmatprep.subr.mxu0 %v293_v40 }
  0x60   :  { %543 = vmatpush3.msra.mxu0 %v293_v40 }
  0x61   :  { %544 = vmatprep.subr.mxu0 %v292_v41 }
  0x62   :  { %545 = vmatpush3.msra.mxu0 %v292_v41 }
  0x63   :  { %546 = vmatprep.subr.mxu0 %v291_v42 }
  0x64   :  { %547 = vmatpush3.msra.mxu0 %v291_v42 }
  0x65   :  { %548 = vmatprep.subr.mxu0 %v290_v43 }
  0x66   :  { %549 = vmatpush3.msra.mxu0 %v290_v43 }
  0x67   :  { %550 = vmatprep.subr.mxu0 %v289_v44 }
  0x68   :  { %551 = vmatpush3.msra.mxu0 %v289_v44 }
  0x69   :  { %552 = vmatprep.subr.mxu0 %v288_v45 }
  0x6a   :  { %553 = vmatpush3.msra.mxu0 %v288_v45 }
  0x6b   :  { %554 = vmatprep.subr.mxu0 %v287_v53 }
  0x6c   :  { %555 = vmatpush3.msra.mxu0 %v287_v53 }
  0x6d   :  { %556 = vmatprep.subr.mxu0 %v286_v54 }
  0x6e   :  { %557 = vmatpush3.msra.mxu0 %v286_v54 }
  0x6f   :  { %558 = vmatprep.subr.mxu0 %v285_v55 }
  0x70   :  { %559 = vmatpush3.msra.mxu0 %v285_v55 }
  0x71   :  { %560 = vmatprep.subr.mxu0 %v284_v56 }
  0x72   :  { %561 = vmatpush3.msra.mxu0 %v284_v56 }
 0x112   :  { %v494_v47 = vpop.f32.mrf.mxu0 }
 0x113   :  { %v179_v48 = vadd.f32 %v494_v47, %v403_v46 }
 0x114   :  { %v173_v49 = vpop.f32.mrf.mxu0 }
 0x115   :  { %v174_v50 = vadd.f32 %v403_v46, %v173_v49  ;;  %v183_v52 = vmax.f32 %v179_v48, 0.0 }
 0x117   :  { %v182_v51 = vmax.f32 %v174_v50, 0.0 }
 0x119   :  { %527 = vmatprep.mubr.f32.mxu1 %v182_v51 }
 0x11a   :  { %528 = vmatmul.mubr.f32.vlgmr.msra.gmra.mxu1 %v183_v52 }
 0x1da   :  { %v529_v58 = vpop.f32.mrf.mxu1 }
 0x1db   :  { %v279_v59 = vadd.f32 %v529_v58, %v404_v57 }
 0x1dc   :  { %v273_v60 = vpop.f32.mrf.mxu1 }
 0x1dd   :  { %v274_v61 = vadd.f32 %v404_v57, %v273_v60  ;;  %v283_v63 = vmax.f32 %v279_v59, 0.0 }
 0x1df   :  { %v282_v62 = vmax.f32 %v274_v61, 0.0 }
 0x1e1   :  { %562 = vmatprep.mubr.f32.mxu0 %v282_v62 }
 0x1e2   :  { %563 = vmatmul.mubr.f32.vlgmr.msra.gmra.mxu0 %v283_v63 }
 0x2a2   :  { %v564_v1 = vpop.f32.mrf.mxu0 }
 0x2a3   :  { %v379_v2 = vadd.f32 %v564_v1, %v405_v0 }
 0x2a4   :  { %v373_v3 = vpop.f32.mrf.mxu0 }
 0x2a5   :  { %383 = vst [vmem:[#allocation10 + $0x8] sm:$0xff] %v379_v2  ;;  %v374_v4 = vadd.f32 %v405_v0, %v373_v3 }
 0x2a7   :  { %382 = vst [vmem:[#allocation10] sm:$0xff] %v374_v4 }
 0x2a8   :  { %663 = shalt.err (!%p660_p10)
}
 0x2a9   :  { %395 = dma.vmem_to_hbm [thread:$0]  %s390_s25, 256, %s773_s7, [#allocation4], %s682_s29, %s682_s29, %s683_s30  }
 0x2aa   :  { %678 = dma.done.wait [#allocation4], 256  }
 0x2ab   :  { %679 = vsyncadd [#allocation4], 4294967040 }
 0x2ac   :  { %399 = vsyncpa [#allocation3], 1 }
 0x2ad   :  { %400 = vsyncpa [#allocation6], 1 }
 0x2ae   :  { %401 = vsyncpa [#allocation9], 1 }
 0x2af   :  { %402 = vsyncpa [#allocation4], 1 }

</bundles_post_ra>
